<compile_context>
chip_gen: v5e
topology: v5e:2x2
jax: 0.10.0
libtpu: 0.0.40
codegen_flags: <defaults>
</compile_context>

<pallas_src>
import math
from functools import partial

import jax
import jax.numpy as jnp
from jax.experimental import pallas as pl
from jax.experimental.pallas import tpu as pltpu

_VMEM_LIMIT = 64 * 1024 * 1024       # raised scoped-VMEM limit (default is 16-32 MiB)
_LN_EPS = 1e-5                       # matches torch.nn.LayerNorm default


# ----------------------------- tiling helpers -------------------------------

def _round_up(x, m):
    return ((x + m - 1) // m) * m


def _row_tile(m, target=512):
    """Row (sublane-axis) tile: big tiles amortize per-grid-step overhead."""
    if m <= target:
        return _round_up(max(m, 8), 8)
    for t in (512, 256, 128, 64, 32, 16, 8):
        if m % t == 0:
            return t
    return target                     # caller pads M up to a multiple of this


def _col_tile(n, target=512):
    """Output-column (lane-axis) tile; n is either small or a multiple of 128."""
    if n <= target:
        return n
    for t in (512, 384, 256, 128):
        if n % t == 0:
            return t
    return n


def _pad_rows(x, tm):
    m = x.shape[0]
    mp = _round_up(m, tm)
    if mp != m:
        x = jnp.pad(x, ((0, mp - m), (0, 0)))
    return x


def _cparams(sem):
    return pltpu.CompilerParams(dimension_semantics=sem,
                                vmem_limit_bytes=_VMEM_LIMIT)


# ----------------------------- Pallas kernels ------------------------------

def _linear_kernel(x_ref, w_ref, b_ref, o_ref):
    # y = x @ W + b      x:[tm,K] f32 -> bf16,  W:[K,tn] bf16,  acc f32
    o_ref[...] = (jnp.dot(x_ref[...].astype(jnp.bfloat16), w_ref[...],
                          preferred_element_type=jnp.float32) + b_ref[...])


def linear(x, w, b):
    """y = x @ w + b, tiled over rows (M) and output columns (N)."""
    M, K = x.shape
    N = w.shape[1]
    tm = _row_tile(M)
    tn = _col_tile(N)
    xp = _pad_rows(x, tm)
    Mp = xp.shape[0]
    out = pl.pallas_call(
        _linear_kernel,
        out_shape=jax.ShapeDtypeStruct((Mp, N), jnp.float32),
        grid=(Mp // tm, N // tn),
        in_specs=[pl.BlockSpec((tm, K), lambda i, j: (i, 0)),
                  pl.BlockSpec((K, tn), lambda i, j: (0, j)),   # weight resident
                  pl.BlockSpec((1, tn), lambda i, j: (0, j))],
        out_specs=pl.BlockSpec((tm, tn), lambda i, j: (i, j)),
        compiler_params=_cparams(("parallel", "parallel")),
    )(xp, w, b.reshape(1, N))
    return out[:M] if Mp != M else out


def _proj_add_ln_kernel(x_ref, w_ref, b_ref, r_ref, g_ref, bt_ref, o_ref):
    # y = LayerNorm(residual + (x @ W + b)) * gamma + beta
    y = jnp.dot(x_ref[...].astype(jnp.bfloat16), w_ref[...],
                preferred_element_type=jnp.float32) + b_ref[...]
    z = r_ref[...] + y
    mean = jnp.mean(z, axis=-1, keepdims=True)
    var = jnp.mean((z - mean) ** 2, axis=-1, keepdims=True)
    o_ref[...] = (z - mean) * jax.lax.rsqrt(var + _LN_EPS) * g_ref[...] + bt_ref[...]


def proj_add_ln(x, w, b, res, gamma, beta):
    M, D = x.shape
    tm = _row_tile(M)
    xp, rp = _pad_rows(x, tm), _pad_rows(res, tm)
    Mp = xp.shape[0]
    out = pl.pallas_call(
        _proj_add_ln_kernel,
        out_shape=jax.ShapeDtypeStruct((Mp, D), jnp.float32),
        grid=(Mp // tm,),
        in_specs=[pl.BlockSpec((tm, D), lambda i: (i, 0)),
                  pl.BlockSpec((D, D), lambda i: (0, 0)),
                  pl.BlockSpec((1, D), lambda i: (0, 0)),
                  pl.BlockSpec((tm, D), lambda i: (i, 0)),
                  pl.BlockSpec((1, D), lambda i: (0, 0)),
                  pl.BlockSpec((1, D), lambda i: (0, 0))],
        out_specs=pl.BlockSpec((tm, D), lambda i: (i, 0)),
        compiler_params=_cparams(("parallel",)),
    )(xp, w, b.reshape(1, D), rp, gamma.reshape(1, D), beta.reshape(1, D))
    return out[:M] if Mp != M else out


def _ffn_add_ln_kernel(x_ref, w1_ref, b1_ref, w2_ref, b2_ref, g_ref, bt_ref, o_ref):
    # y = LayerNorm(x + (relu(x @ W1 + b1) @ W2 + b2)) * gamma + beta
    x = x_ref[...]
    h = jnp.dot(x.astype(jnp.bfloat16), w1_ref[...],
                preferred_element_type=jnp.float32) + b1_ref[...]
    h = jnp.maximum(h, 0.0)
    y = jnp.dot(h.astype(jnp.bfloat16), w2_ref[...],
                preferred_element_type=jnp.float32) + b2_ref[...]
    z = x + y
    mean = jnp.mean(z, axis=-1, keepdims=True)
    var = jnp.mean((z - mean) ** 2, axis=-1, keepdims=True)
    o_ref[...] = (z - mean) * jax.lax.rsqrt(var + _LN_EPS) * g_ref[...] + bt_ref[...]


def ffn_add_ln(x, ffn_p, gamma, beta):
    M, D = x.shape
    H = ffn_p["w1"].shape[1]
    tm = _row_tile(M)
    xp = _pad_rows(x, tm)
    Mp = xp.shape[0]
    out = pl.pallas_call(
        _ffn_add_ln_kernel,
        out_shape=jax.ShapeDtypeStruct((Mp, D), jnp.float32),
        grid=(Mp // tm,),
        in_specs=[pl.BlockSpec((tm, D), lambda i: (i, 0)),
                  pl.BlockSpec((D, H), lambda i: (0, 0)),
                  pl.BlockSpec((1, H), lambda i: (0, 0)),
                  pl.BlockSpec((H, D), lambda i: (0, 0)),
                  pl.BlockSpec((1, D), lambda i: (0, 0)),
                  pl.BlockSpec((1, D), lambda i: (0, 0)),
                  pl.BlockSpec((1, D), lambda i: (0, 0))],
        out_specs=pl.BlockSpec((tm, D), lambda i: (i, 0)),
        compiler_params=_cparams(("parallel",)),
    )(xp, ffn_p["w1"], ffn_p["b1"].reshape(1, H), ffn_p["w2"],
      ffn_p["b2"].reshape(1, D), gamma.reshape(1, D), beta.reshape(1, D))
    return out[:M] if Mp != M else out


# ----------------------------- attention kernels ---------------------------

def _attend_heads(q_all, k_all, v_all, mask_keep, heads, hd):
    """Per-head attention with in-kernel head slicing; returns [Sq, H*hd]."""
    outs = []
    for h in range(heads):                               # static unroll
        q = q_all[:, h * hd:(h + 1) * hd].astype(jnp.bfloat16)
        k = k_all[:, h * hd:(h + 1) * hd].astype(jnp.bfloat16)
        v = v_all[:, h * hd:(h + 1) * hd].astype(jnp.bfloat16)
        s = jnp.dot(q, k.T, preferred_element_type=jnp.float32)
        # Fully-masked rows -> uniform attention (same as the -1e9 masked_fill
        # convention in the PyTorch reference).
        s = jnp.where(mask_keep, s, -1e9)
        s = s - jnp.max(s, axis=-1, keepdims=True)
        p = jnp.exp(s)
        p = p * pl.reciprocal(jnp.sum(p, axis=-1, keepdims=True), approx=True)
        outs.append(jnp.dot(p.astype(jnp.bfloat16), v,
                            preferred_element_type=jnp.float32))
    return jnp.concatenate(outs, axis=-1)                # lane-dense [Sq, D]


def _self_attn_kernel(qkv_ref, m_ref, o_ref, *, heads, d):
    qkv = qkv_ref[0]                                     # [Sq, 3D] packed
    mask_keep = m_ref[0] > 0.5
    hd = d // heads
    o_ref[0] = _attend_heads(qkv[:, :d], qkv[:, d:2 * d], qkv[:, 2 * d:3 * d],
                             mask_keep, heads, hd)


def _cross_attn_kernel(q_ref, kv_ref, m_ref, o_ref, *, heads, d):
    q = q_ref[0]                                         # [Sq, D]
    kv = kv_ref[0]                                       # [Sk, 2D] packed
    mask_keep = m_ref[0] > 0.5
    hd = d // heads
    o_ref[0] = _attend_heads(q, kv[:, :d], kv[:, d:2 * d], mask_keep, heads, hd)


def self_attention(qkv, mask, heads, d):
    B, Sq, _ = qkv.shape
    return pl.pallas_call(
        partial(_self_attn_kernel, heads=heads, d=d),
        out_shape=jax.ShapeDtypeStruct((B, Sq, d), jnp.float32),
        grid=(B,),
        in_specs=[pl.BlockSpec((1, Sq, 3 * d), lambda b: (b, 0, 0)),
                  pl.BlockSpec((1, Sq, Sq), lambda b: (b, 0, 0))],
        out_specs=pl.BlockSpec((1, Sq, d), lambda b: (b, 0, 0)),
        compiler_params=_cparams(("parallel",)),
    )(qkv, mask)


def cross_attention(q, kv, mask, heads, d):
    B, Sq, _ = q.shape
    Sk = kv.shape[1]
    return pl.pallas_call(
        partial(_cross_attn_kernel, heads=heads, d=d),
        out_shape=jax.ShapeDtypeStruct((B, Sq, d), jnp.float32),
        grid=(B,),
        in_specs=[pl.BlockSpec((1, Sq, d), lambda b: (b, 0, 0)),
                  pl.BlockSpec((1, Sk, 2 * d), lambda b: (b, 0, 0)),
                  pl.BlockSpec((1, Sq, Sk), lambda b: (b, 0, 0))],
        out_specs=pl.BlockSpec((1, Sq, d), lambda b: (b, 0, 0)),
        compiler_params=_cparams(("parallel",)),
    )(q, kv, mask)


# ------------------------------- model glue --------------------------------

def mha_self(p, x_flat, B, S, D, mask, heads):
    qkv = linear(x_flat, p["wqkv"], p["bqkv"])               # fused QKV, [M, 3D]
    ctx = self_attention(qkv.reshape(B, S, 3 * D), mask, heads, D)
    return ctx.reshape(B * S, D)


def mha_cross(p, x_flat, enc_flat, B, Sq, Sk, D, mask, heads):
    q = linear(x_flat, p["wq"], p["bq"])                     # [Mq, D]
    kv = linear(enc_flat, p["wkv"], p["bkv"])                # fused KV, [Mk, 2D]
    ctx = cross_attention(q.reshape(B, Sq, D), kv.reshape(B, Sk, 2 * D),
                          mask, heads, D)
    return ctx.reshape(B * Sq, D)


def decoder_block(p, trg_flat, enc_flat, B, S, Sk, D, trg_mask, src_mask, heads):
    # self attention -> fused (out-proj + residual + LN); dropout = identity
    sa = mha_self(p["self_attn"], trg_flat, B, S, D, trg_mask, heads)
    trg_flat = proj_add_ln(sa, p["self_attn"]["wo"], p["self_attn"]["bo"],
                           trg_flat, p["attn_ln_g"], p["attn_ln_b"])
    # encoder (cross) attention -> fused (out-proj + residual + LN)
    ca = mha_cross(p["enc_attn"], trg_flat, enc_flat, B, S, Sk, D, src_mask, heads)
    trg_flat = proj_add_ln(ca, p["enc_attn"]["wo"], p["enc_attn"]["bo"],
                           trg_flat, p["enc_ln_g"], p["enc_ln_b"])
    # fused feed-forward + residual + LN
    return ffn_add_ln(trg_flat, p["ffn"], p["ff_ln_g"], p["ff_ln_b"])


def decoder_forward(params, trg_ids, enc_out, trg_mask, src_mask):
    B, S = trg_ids.shape
    D = params["emb"].shape[1]
    Sk = enc_out.shape[1]
    # word embedding (gather, XLA) + sinusoidal positional encoding; dropout = identity
    x = jnp.take(params["emb"], trg_ids, axis=0) + params["pe"][:S][None, :, :]
    x = x.reshape(B * S, D)
    enc_flat = enc_out.reshape(B * Sk, D)
    for lp in params["layers"]:
        x = decoder_block(lp, x, enc_flat, B, S, Sk, D, trg_mask, src_mask,
                          params["heads"])
    logits = linear(x, params["w_out"], params["b_out"])     # [M, V_pad], N-tiled
    V = params["vocab"]
    return logits[:, :V].reshape(B, S, V)


# ---------------------------- parameter set-up -----------------------------

def sinusoidal_pe(max_len, D):
    pos = jnp.arange(max_len, dtype=jnp.float32)[:, None]
    i = jnp.arange(0, D, 2, dtype=jnp.float32)
    div = jnp.exp(-jnp.log(10000.0) * i / D)
    pe = jnp.zeros((max_len, D), jnp.float32)
    pe = pe.at[:, 0::2].set(jnp.sin(pos * div))
    pe = pe.at[:, 1::2].set(jnp.cos(pos * div))
    return pe


def _dense(key, shape, scale=0.02):
    return (scale * jax.random.normal(key, shape)).astype(jnp.float32)


def init_self_attn(key, D, heads):
    ks = jax.random.split(key, 4)
    scale = 1.0 / math.sqrt(D // heads)
    wq = _dense(ks[0], (D, D)) * scale        # 1/sqrt(hd) folded into Wq (+bq)
    wk, wv, wo = _dense(ks[1], (D, D)), _dense(ks[2], (D, D)), _dense(ks[3], (D, D))
    return {"wqkv": jnp.concatenate([wq, wk, wv], axis=1).astype(jnp.bfloat16),
            "bqkv": jnp.zeros((3 * D,), jnp.float32),
            "wo": wo.astype(jnp.bfloat16),
            "bo": jnp.zeros((D,), jnp.float32)}


def init_cross_attn(key, D, heads):
    ks = jax.random.split(key, 4)
    scale = 1.0 / math.sqrt(D // heads)
    wq = _dense(ks[0], (D, D)) * scale
    wk, wv, wo = _dense(ks[1], (D, D)), _dense(ks[2], (D, D)), _dense(ks[3], (D, D))
    return {"wq": wq.astype(jnp.bfloat16),
            "bq": jnp.zeros((D,), jnp.float32),
            "wkv": jnp.concatenate([wk, wv], axis=1).astype(jnp.bfloat16),
            "bkv": jnp.zeros((2 * D,), jnp.float32),
            "wo": wo.astype(jnp.bfloat16),
            "bo": jnp.zeros((D,), jnp.float32)}


def init_params(key, vocab, D, num_layers, heads, expansion, max_len):
    keys = jax.random.split(key, 2 + num_layers)
    layers = []
    for li in range(num_layers):
        lk = jax.random.split(keys[2 + li], 4)
        layers.append({
            "self_attn": init_self_attn(lk[0], D, heads),
            "enc_attn": init_cross_attn(lk[1], D, heads),
            "ffn": {"w1": _dense(lk[2], (D, D * expansion)).astype(jnp.bfloat16),
                    "b1": jnp.zeros((D * expansion,), jnp.float32),
                    "w2": _dense(lk[3], (D * expansion, D)).astype(jnp.bfloat16),
                    "b2": jnp.zeros((D,), jnp.float32)},
            "attn_ln_g": jnp.ones((D,), jnp.float32),
            "attn_ln_b": jnp.zeros((D,), jnp.float32),
            "enc_ln_g": jnp.ones((D,), jnp.float32),
            "enc_ln_b": jnp.zeros((D,), jnp.float32),
            "ff_ln_g": jnp.ones((D,), jnp.float32),
            "ff_ln_b": jnp.zeros((D,), jnp.float32),
        })
    # vocab projection padded to a lane-dense multiple of 128 (sliced back after)
    v_pad = _round_up(vocab, 128)
    w_out = jnp.zeros((D, v_pad), jnp.float32).at[:, :vocab].set(
        _dense(keys[1], (D, vocab))).astype(jnp.bfloat16)
    return {"emb": _dense(keys[0], (vocab, D)),
            "pe": sinusoidal_pe(max_len, D),
            "w_out": w_out,
            "b_out": jnp.zeros((v_pad,), jnp.float32),
            "vocab": vocab,
            "heads": heads,
            "layers": layers}


# ----------------------------------- main -----------------------------------

if __name__ == "__main__":
    B, S_trg, S_src = 2, 8, 8
    D, heads, expansion = 32, 4, 4
    num_layers, vocab, max_len = 2, 50, 16

    key = jax.random.PRNGKey(0)
    k_par, k_ids, k_enc = jax.random.split(key, 3)

    params = init_params(k_par, vocab, D, num_layers, heads, expansion, max_len)

    trg_ids = jax.random.randint(k_ids, (B, S_trg), 0, vocab, dtype=jnp.int32)
    enc_out = jax.random.normal(k_enc, (B, S_src, D), dtype=jnp.float32)

    # target mask: causal lower-triangular [B, S_trg, S_trg]
    trg_mask = jnp.broadcast_to(
        jnp.tril(jnp.ones((S_trg, S_trg), jnp.float32)), (B, S_trg, S_trg))
    # source mask: padding mask [B, S_trg, S_src] (mask out last 2 src tokens of batch 1)
    src_valid = jnp.ones((B, S_src), jnp.float32).at[1, -2:].set(0.0)
    src_mask = jnp.broadcast_to(src_valid[:, None, :], (B, S_trg, S_src))

    out = decoder_forward(params, trg_ids, enc_out, trg_mask, src_mask)
    out = jax.block_until_ready(out)
    assert out.shape == (B, S_trg, vocab)
    assert bool(jnp.all(jnp.isfinite(out)))
    print("KERNEL_OK")
</pallas_src>

<mosaic_0001>
module attributes {stable_mosaic.version = 11 : i64} {
  func.func @_linear_kernel(%arg0: i32, %arg1: i32, %arg2: memref<16x32xf32, #tpu.memory_space<vmem>>, %arg3: memref<32x96xbf16, #tpu.memory_space<vmem>>, %arg4: memref<1x96xf32, #tpu.memory_space<vmem>>, %arg5: memref<16x96xf32, #tpu.memory_space<vmem>>) attributes {dimension_semantics = [#tpu.dimension_semantics<parallel>, #tpu.dimension_semantics<parallel>], iteration_bounds = array<i64: 1, 1>, scalar_prefetch = 0 : i64, scratch_operands = 0 : i64, tpu.core_type = #tpu.core_type<tc>, window_params = [{transform_indices = @transform_0, window_bounds = array<i64: 16, 32>}, {transform_indices = @transform_1, window_bounds = array<i64: 32, 96>}, {transform_indices = @transform_2, window_bounds = array<i64: 1, 96>}, {transform_indices = @transform_3, window_bounds = array<i64: 16, 96>}]} {
    %c0 = arith.constant 0 : index
    %c0_0 = arith.constant 0 : index
    %0 = vector.load %arg2[%c0, %c0_0] : memref<16x32xf32, #tpu.memory_space<vmem>>, vector<16x32xf32>
    %1 = arith.truncf %0 : vector<16x32xf32> to vector<16x32xbf16>
    %c0_1 = arith.constant 0 : index
    %c0_2 = arith.constant 0 : index
    %2 = vector.load %arg3[%c0_1, %c0_2] : memref<32x96xbf16, #tpu.memory_space<vmem>>, vector<32x96xbf16>
    %cst = arith.constant dense<0.000000e+00> : vector<16x96xf32>
    %3 = tpu.matmul %1, %2, %cst {dimension_numbers = #tpu.dot_dimension_numbers<[1], [0], [0], [1], [0, 0, 1, 1], [], []>} : vector<16x32xbf16>, vector<32x96xbf16>, vector<16x96xf32> -> vector<16x96xf32>
    %c0_3 = arith.constant 0 : index
    %c0_4 = arith.constant 0 : index
    %4 = vector.load %arg4[%c0_3, %c0_4] : memref<1x96xf32, #tpu.memory_space<vmem>>, vector<1x96xf32>
    %5 = vector.broadcast %4 : vector<1x96xf32> to vector<16x96xf32>
    %6 = arith.addf %3, %5 : vector<16x96xf32>
    %c0_5 = arith.constant 0 : index
    %c0_6 = arith.constant 0 : index
    %7 = vector.load %arg5[%c0_5, %c0_6] : memref<16x96xf32, #tpu.memory_space<vmem>>, vector<16x96xf32>
    tpu.vector_store %arg5[%c0_5, %c0_6], %6 {strides = array<i32>} : memref<16x96xf32, #tpu.memory_space<vmem>>, vector<16x96xf32>,
    return
  }
  func.func @transform_0(%arg0: i32, %arg1: i32) -> (i32, i32) {
    %c0_i32 = arith.constant 0 : i32
    %c0_i32_0 = arith.constant 0 : i32
    return %arg0, %c0_i32 : i32, i32
  }
  func.func @transform_1(%arg0: i32, %arg1: i32) -> (i32, i32) {
    %c0_i32 = arith.constant 0 : i32
    %c0_i32_0 = arith.constant 0 : i32
    return %c0_i32, %arg1 : i32, i32
  }
  func.func @transform_2(%arg0: i32, %arg1: i32) -> (i32, i32) {
    %c0_i32 = arith.constant 0 : i32
    %c0_i32_0 = arith.constant 0 : i32
    return %c0_i32, %arg1 : i32, i32
  }
  func.func @transform_3(%arg0: i32, %arg1: i32) -> (i32, i32) {
    %c0_i32 = arith.constant 0 : i32
    return %arg0, %arg1 : i32, i32
  }
}

</mosaic_0001>

<bundles_post_ra>
// kernel: tpu_custom_call.1
= control target key start
LH: loop header
LB: loop body
LE: loop exit
PB: predicated region body
PF: predicated region fallthrough
CT: control target
= control target key end

     0   :  { %8 = vsyncpa [#allocation3], 0  ;;  %s254_s0 = inlined_call_operand.hbm [shape: f32[16,32], index: 0, kind: input, shape index: {}]   ;;  %s255_s1 = inlined_call_operand.hbm [shape: bf16[32,96], index: 1, kind: input, shape index: {}]   ;;  %s256_s2 = inlined_call_operand.vmem [shape: f32[1,96], index: 2, kind: input, shape index: {}]   ;;  %s257_s3 = inlined_call_operand.hbm [shape: f32[16,96], index: 3, kind: output, shape index: {}]  }
   0x1   :  { %9 = vsyncpa [#allocation6], 0 }
   0x2   :  { %10 = vsyncpa [#allocation4], 0  ;;  %s15_s14 = sshll.u32 %s254_s0, 4  ;;  %s209_s15 = smov [#allocation2]   ;;  %s16_s14 = int_to_ptr.hbm [resolvable:$true] %s15_s14 }
   0x3   :  { %s17_s16 = sshll.u32 %s209_s15, 4  ;;  %s28_s19 = sshll.u32 %s255_s1, 4  ;;  %s18_s16 = int_to_ptr.vmem [resolvable:$true] %s17_s16  ;;  %s29_s19 = int_to_ptr.hbm [resolvable:$true] %s28_s19 }
   0x4   :  { %s210_s20 = smov 128   ;;  %s211_s21 = smov 8  }
   0x5   :  { %23 = dma.hbm_to_vmem [thread:$0]  %s16_s14, 256, %s18_s16, [#allocation3], %s210_s20, %s210_s20, %s211_s21  }
   0x6   :  { %s212_s22 = smov [#allocation5]   ;;  %s213_s24 = smov 64  }
   0x7   :  { %s30_s23 = sshll.u32 %s212_s22, 4  ;;  %s214_s0 = smov 4   ;;  %s31_s23 = int_to_ptr.vmem [resolvable:$true] %s30_s23 }
   0x8   :  { %36 = dma.hbm_to_vmem [thread:$0]  %s29_s19, 256, %s31_s23, [#allocation6], %s213_s24, %s213_s24, %s214_s0  }
   0x9   :  { %203 = dma.done.wait [#allocation3], 256  }
   0xa   :  { %204 = vsyncadd [#allocation3], 4294967040 }
   0xb   :  { %205 = dma.done.wait [#allocation6], 256  }
   0xc   :  { %206 = vsyncadd [#allocation6], 4294967040  ;;  %v122_v0 = vld [vmem:[#allocation5 + $0x8] sm:$0xff]  ;;  %v121_v1 = vld [vmem:[#allocation5] sm:$0xff]  ;;  %vm71_vm0 = vcmask 261120   ;;  %vm89_vm1 = vcmask 785408  }
   0xd   :  { %81 = vmatpush.bf16.msra.mxu0 %v122_v0  ;;  %v48_v2 = vld [vmem:[#allocation2] sm:$0xff]  ;;  %v49_v3 = vld [vmem:[#allocation2 + $0x8] sm:$0xff]  ;;  %s215_s26 = smov [#allocation7]   ;;  %s98_s30 = sshll.u32 %s257_s3, 4  ;;  %s99_s30 = int_to_ptr.hbm [resolvable:$true] %s98_s30 }
   0xe   :  { %v50_v4 = vpack.c.bf16 %v49_v3, %v48_v2  ;;  %v130_v5 = vld [vmem:[%s256_s2] ss:$0 sm:$0xff]  ;;  %s96_s27 = sshll.u32 %s215_s26, 4  ;;  %s97_s27 = int_to_ptr.vmem [resolvable:$true] %s96_s27 }
  0x11   :  { %82 = vmatpush.bf16.msra.mxu0 %v121_v1 }
  0x14   :  { %120 = vmatmul.msk.bf16.vlgmr.msra.gmra.mxu0 %vm71_vm0, %v50_v4 }
  0x91   :  { %v84_v6 = vpop.f32.mrf.mxu0 }
  0x92   :  { %v85_v7 = vadd.f32 %v130_v5, %v84_v6 }
  0x94   :  { %90 = vst.msk [vmem:[#allocation7] sm:$0xff] %vm89_vm1, %v85_v7 }
  0x99   :  { %v86_v8 = vpop.f32.mrf.mxu0 }
  0x9a   :  { %v87_v9 = vadd.f32 %v130_v5, %v86_v8 }
  0x9c   :  { %91 = vst.msk [vmem:[#allocation7 + $0x8] sm:$0xff] %vm89_vm1, %v87_v9 }
  0x9d   :  { %104 = dma.vmem_to_hbm [thread:$0]  %s97_s27, 256, %s99_s30, [#allocation4], %s210_s20, %s210_s20, %s211_s21  }
  0x9e   :  { %207 = dma.done.wait [#allocation4], 256  }
  0x9f   :  { %208 = vsyncadd [#allocation4], 4294967040 }
  0xa0   :  { %109 = vsyncpa [#allocation3], 1 }
  0xa1   :  { %110 = vsyncpa [#allocation6], 1 }
  0xa2   :  { %111 = vsyncpa [#allocation4], 1 }

</bundles_post_ra>
